<compile_context>
chip_gen: v6e
topology: v6e:2x2x1
jax: 0.10.0
libtpu: 0.0.40
codegen_flags: <defaults>
</compile_context>

<pallas_src>
import functools

import jax
import jax.numpy as jnp
from jax.experimental import pallas as pl
from jax.experimental.pallas import tpu as pltpu


# --------------------------------------------------------------------------------------
# Kernel
# --------------------------------------------------------------------------------------
def _loss_sums_kernel(pred_ref, targ_ref, mask_ref,
                      sq_ref, abs_ref, smooth_ref,
                      *, tile_bc, t_true, resident_mask):
    """One (tile_bc, T) tile: accumulate per-vreg partials into (8, T) accumulators."""
    step = pl.program_id(1)
    n_steps = pl.num_programs(1)

    @pl.when(step == 0)
    def _init():
        sq_ref[...] = jnp.zeros_like(sq_ref)
        abs_ref[...] = jnp.zeros_like(abs_ref)
        smooth_ref[...] = jnp.zeros_like(smooth_ref)

    p = pred_ref[...].astype(jnp.float32)          # [tile_bc, T_k]
    t = targ_ref[...].astype(jnp.float32)          # [tile_bc, T_k]

    if resident_mask:
        core = pl.program_id(0)
        off = pl.multiple_of((core * n_steps + step) * tile_bc, 8)
        m = mask_ref[pl.ds(off, tile_bc), :]       # [tile_bc, 1] slice of resident mask
    else:
        m = mask_ref[...]                          # [tile_bc, 1]

    t_k = p.shape[-1]
    groups = tile_bc // 8

    def vreg_partial(x):
        # [tile_bc, W] -> [8, W] via VPU adds only (split of the sublane axis by its
        # native tile of 8 is layout preserving; the reduce runs over the outer axis).
        return jnp.sum(x.reshape(groups, 8, x.shape[-1]), axis=0)

    # masked_pred - masked_target == (p - t) * m  (mask broadcast over T).
    d = (p - t) * m
    sq_ref[...] += vreg_partial(d * d)
    abs_ref[...] += vreg_partial(jnp.abs(d))

    # smoothness: sum(diff(p, axis=-1) ** 2) over the *real* T columns.
    if t_true > 1:
        if t_k % 128 == 0:
            # shifted[:, i] = p[:, (i + 1) % t_k]  (XLU rotate, free slot vs VPU)
            shifted = pltpu.roll(p, shift=t_k - 1, axis=1)
            pd = shifted - p
            col = jax.lax.broadcasted_iota(jnp.int32, (tile_bc, t_k), 1)
            pd = jnp.where(col < t_true - 1, pd, 0.0)   # drop wrap + padded columns
            smooth_ref[...] += vreg_partial(pd * pd)
        else:
            # small T (< 128): sliced diff on the full-extent block.
            pd = p[:, 1:] - p[:, :-1]
            smooth_ref[:, : t_k - 1] += vreg_partial(pd * pd)


# --------------------------------------------------------------------------------------
# Sizing helpers (generation-aware)
# --------------------------------------------------------------------------------------
def _round_up(x, m):
    return (x + m - 1) // m * m


def _padded_t(t):
    # Pad large, non-lane-aligned T up to a multiple of 128 so the roll path applies.
    if t > 128 and t % 128 != 0:
        return _round_up(t, 128)
    return t


def _vmem_params():
    """(vmem_limit_bytes, tile_budget_bytes) derived from the device's VMEM capacity."""
    try:
        cap = int(pltpu.get_tpu_info().vmem_capacity_bytes)
        if cap <= 0:
            raise ValueError("bad vmem capacity")
    except Exception:
        cap = 64 * 1024 * 1024          # conservative fallback: assume v7x-class VMEM
    # v7x (64 MiB):   limit 48 MiB, tile budget 24 MiB
    # v5e/v6e (128):  limit 96 MiB, tile budget 48 MiB
    vmem_limit = max(32 * 1024 * 1024, min(cap * 3 // 4, 100 * 1024 * 1024))
    tile_budget = vmem_limit // 2
    return int(vmem_limit), int(tile_budget)


def _choose_tile_bc(bc, t_k, itemsize, tile_budget):
    """Largest B*C tile whose DMA buffers + f32 temporaries fit in the budget."""
    # 2 inputs x 2 pipeline buffers at native dtype + ~5 f32 tile temporaries
    # (f32 casts, diff, squares, rolled copy) + lane-padded mask buffer per row.
    per_row = t_k * (4 * itemsize + 5 * 4) + 1024
    # output accumulators (double-buffered) + resident-mask allowance.
    fixed = 3 * 2 * 8 * t_k * 4 + 4 * 1024 * 1024
    usable = max(tile_budget - fixed, 2 * 1024 * 1024)
    tile = int(usable // per_row)
    tile = min(tile, 8192)
    tile -= tile % 8
    # No point exceeding half the rows: both TensorCores should get work.
    half_rows = _round_up(max((bc + 1) // 2, 1), 8)
    tile = min(tile, half_rows)
    return max(tile, 8)


def _grid_geometry(bc, tile_bc):
    total_tiles = -(-bc // tile_bc)
    n_steps = -(-total_tiles // 2)          # steps per TensorCore
    return n_steps, 2 * n_steps * tile_bc   # (steps, padded row count)


# --------------------------------------------------------------------------------------
# pallas_call wrapper
# --------------------------------------------------------------------------------------
def _partial_sums(p2, t2, m2, *, tile_bc, n_steps, t_true, resident_mask, vmem_limit):
    bc_pad, t_k = p2.shape
    part_shape = jax.ShapeDtypeStruct((2 * 8, t_k), jnp.float32)
    out_spec = pl.BlockSpec((8, t_k), lambda c, i: (c, 0))           # per-core accumulator
    data_spec = pl.BlockSpec((tile_bc, t_k), lambda c, i: (c * n_steps + i, 0))
    if resident_mask:
        mask_spec = pl.BlockSpec((bc_pad, 1), lambda c, i: (0, 0))   # DMA'd once, stays in VMEM
    else:
        mask_spec = pl.BlockSpec((tile_bc, 1), lambda c, i: (c * n_steps + i, 0))

    kernel = functools.partial(_loss_sums_kernel, tile_bc=tile_bc, t_true=t_true,
                               resident_mask=resident_mask)
    return pl.pallas_call(
        kernel,
        grid=(2, n_steps),
        in_specs=[data_spec, data_spec, mask_spec],
        out_shape=(part_shape,) * 3,
        out_specs=(out_spec,) * 3,
        compiler_params=pltpu.CompilerParams(
            dimension_semantics=("parallel", "arbitrary"),
            vmem_limit_bytes=int(vmem_limit),
        ),
    )(p2, t2, m2)


@functools.partial(jax.jit,
                   static_argnames=("has_mask", "tile_bc", "vmem_limit", "resident_mask"))
def _simple_enhanced_loss_impl(predictions, targets, logits, labels, real_mask,
                               recon_weight, cls_weight, l1_weight, smooth_weight,
                               *, has_mask, tile_bc, vmem_limit, resident_mask):
    B, C, T = predictions.shape
    bc = B * C

    # Stream in native dtype; cast to f32 inside the kernel.
    p2 = predictions.reshape(bc, T)
    t2 = targets.reshape(bc, T)
    m2 = real_mask.reshape(bc, 1).astype(jnp.float32)

    t_k = _padded_t(T)
    if t_k != T:
        p2 = jnp.pad(p2, ((0, 0), (0, t_k - T)))
        t2 = jnp.pad(t2, ((0, 0), (0, t_k - T)))

    n_steps, bc_pad = _grid_geometry(bc, tile_bc)
    if bc_pad != bc:
        p2 = jnp.pad(p2, ((0, bc_pad - bc), (0, 0)))
        t2 = jnp.pad(t2, ((0, bc_pad - bc), (0, 0)))
        m2 = jnp.pad(m2, ((0, bc_pad - bc), (0, 0)))   # padded rows contribute exactly 0

    sq_part, abs_part, smooth_part = _partial_sums(
        p2, t2, m2, tile_bc=tile_bc, n_steps=n_steps, t_true=T,
        resident_mask=resident_mask, vmem_limit=vmem_limit)

    # Tiny final reductions of the (16, T) per-core/vreg partials: plain XLA.
    sq_sum = jnp.sum(sq_part)
    abs_sum = jnp.sum(abs_part)
    smooth_sq_sum = jnp.sum(smooth_part)

    # Mask sum hoisted out of the kernel (torch sums the mask AFTER expanding over T).
    mask_row_sum = jnp.sum(real_mask.astype(jnp.float32))

    if has_mask:
        denom = mask_row_sum * jnp.float32(T) + 1e-08
        mse_loss = sq_sum / denom
        l1_loss = abs_sum / denom
    else:
        n_elem = jnp.float32(bc * T)
        mse_loss = sq_sum / n_elem
        l1_loss = abs_sum / n_elem

    # Cross entropy on the tiny [B, num_classes] logits: plain JAX.
    lg = logits.astype(jnp.float32)
    lse = jax.scipy.special.logsumexp(lg, axis=-1)
    lab = labels.astype(jnp.int32)
    label_logit = jnp.take_along_axis(lg, lab[:, None], axis=-1)[:, 0]
    cls_loss = jnp.mean(lse - label_logit)

    smooth_loss = smooth_sq_sum / jnp.float32(bc * (T - 1))

    reconstruction_loss = mse_loss + l1_weight * l1_loss
    total_loss = (recon_weight * reconstruction_loss
                  + cls_weight * cls_loss
                  + smooth_weight * smooth_loss)

    return {
        "total_loss": total_loss,
        "reconstruction_loss": reconstruction_loss,
        "mse_loss": mse_loss,
        "l1_loss": l1_loss,
        "classification_loss": cls_loss,
        "smooth_loss": smooth_loss,
    }


def simple_enhanced_loss(predictions, targets, logits, labels, real_mask=None,
                         recon_weight=1.0, cls_weight=1.0,
                         l1_weight=0.1, smooth_weight=0.05,
                         tile_bc=None, resident_mask=None):
    B, C, T = predictions.shape
    bc = B * C
    has_mask = real_mask is not None
    if real_mask is None:
        real_mask = jnp.ones((B, C), jnp.float32)

    t_k = _padded_t(T)
    vmem_limit, tile_budget = _vmem_params()
    if tile_bc is None:
        tile_bc = _choose_tile_bc(bc, t_k, jnp.dtype(predictions.dtype).itemsize,
                                  tile_budget)
    tile_bc = int(tile_bc)
    tile_bc = max(8, tile_bc - tile_bc % 8)

    _, bc_pad = _grid_geometry(bc, tile_bc)
    if resident_mask is None:
        # Keep the whole mask column resident only while its lane-padded VMEM
        # footprint stays small (<= ~4 MiB).
        resident_mask = bc_pad <= 8192

    return _simple_enhanced_loss_impl(
        predictions, targets, logits, labels, real_mask,
        recon_weight, cls_weight, l1_weight, smooth_weight,
        has_mask=has_mask, tile_bc=tile_bc, vmem_limit=int(vmem_limit),
        resident_mask=bool(resident_mask))


# --------------------------------------------------------------------------------------
# Pure-JAX reference (mirrors the PyTorch module exactly)
# --------------------------------------------------------------------------------------
def _reference(predictions, targets, logits, labels, real_mask=None,
               recon_weight=1.0, cls_weight=1.0, l1_weight=0.1, smooth_weight=0.05):
    p = predictions.astype(jnp.float32)
    t = targets.astype(jnp.float32)
    if real_mask is not None:
        mask = jnp.broadcast_to(real_mask[..., None].astype(jnp.float32), p.shape)
        mp, mt = p * mask, t * mask
        mse = jnp.sum((mp - mt) ** 2) / (jnp.sum(mask) + 1e-08)
        l1 = jnp.sum(jnp.abs(mp - mt)) / (jnp.sum(mask) + 1e-08)
    else:
        mse = jnp.mean((p - t) ** 2)
        l1 = jnp.mean(jnp.abs(p - t))
    lg = logits.astype(jnp.float32)
    lse = jax.scipy.special.logsumexp(lg, axis=-1)
    cls = jnp.mean(lse - jnp.take_along_axis(lg, labels[:, None], axis=-1)[:, 0])
    diff = p[..., 1:] - p[..., :-1]
    smooth = jnp.mean(diff ** 2)
    recon = mse + l1_weight * l1
    total = recon_weight * recon + cls_weight * cls + smooth_weight * smooth
    return {"total_loss": total, "reconstruction_loss": recon, "mse_loss": mse,
            "l1_loss": l1, "classification_loss": cls, "smooth_loss": smooth}


if __name__ == "__main__":
    def make_inputs(key, B, C, T, N):
        k1, k2, k3, k4, k5 = jax.random.split(key, 5)
        predictions = jax.random.normal(k1, (B, C, T), jnp.float32)
        targets = jax.random.normal(k2, (B, C, T), jnp.float32)
        logits = jax.random.normal(k3, (B, N), jnp.float32)
        labels = jax.random.randint(k4, (B,), 0, N, jnp.int32)
        real_mask = jax.random.bernoulli(k5, 0.7, (B, C)).astype(jnp.float32)
        return predictions, targets, logits, labels, real_mask

    # (B, C, T, num_classes, forced tile_bc, forced resident_mask)
    configs = [
        (2, 4, 16, 8, None, None),     # tiny, single tile per core, sliced-diff path
        (3, 5, 16, 6, None, None),     # exercises B*C padding to the tile boundary
        (4, 16, 128, 8, 16, None),     # multi-step accumulation + roll-based diff path
        (4, 16, 128, 8, 16, False),    # blocked (per-step DMA'd) mask path
        (2, 8, 200, 5, None, None),    # T padded to 256, iota-masked roll path
    ]

    key = jax.random.PRNGKey(0)
    for (B, C, T, N, tile_bc, res_mask) in configs:
        key, sub = jax.random.split(key)
        p, t, lg, lab, m = make_inputs(sub, B, C, T, N)
        for mask in (m, None):
            out = simple_enhanced_loss(p, t, lg, lab, mask,
                                       tile_bc=tile_bc, resident_mask=res_mask)
            out = jax.tree_util.tree_map(jax.block_until_ready, out)
            ref = _reference(p, t, lg, lab, mask)
            for name in out:
                a = float(out[name])
                b = float(ref[name])
                assert abs(a - b) <= 2e-5 * (1.0 + abs(b)), (B, C, T, name, a, b)

    print("KERNEL_OK")
</pallas_src>

<mosaic_0001>
module attributes {stable_mosaic.version = 11 : i64} {
  func.func @_loss_sums_kernel(%arg0: i32, %arg1: i32, %arg2: memref<8x16xf32, #tpu.memory_space<vmem>>, %arg3: memref<8x16xf32, #tpu.memory_space<vmem>>, %arg4: memref<16x1xf32, #tpu.memory_space<vmem>>, %arg5: memref<8x16xf32, #tpu.memory_space<vmem>>, %arg6: memref<8x16xf32, #tpu.memory_space<vmem>>, %arg7: memref<8x16xf32, #tpu.memory_space<vmem>>) attributes {dimension_semantics = [#tpu.dimension_semantics<parallel>, #tpu.dimension_semantics<arbitrary>], iteration_bounds = array<i64: 2, 1>, scalar_prefetch = 0 : i64, scratch_operands = 0 : i64, tpu.core_type = #tpu.core_type<tc>, window_params = [{transform_indices = @transform_0, window_bounds = array<i64: 8, 16>}, {transform_indices = @transform_1, window_bounds = array<i64: 8, 16>}, {pipeline_mode = #tpu.pipeline_mode<synchronous>, transform_indices = @transform_2, window_bounds = array<i64: 16, 1>}, {transform_indices = @transform_3, window_bounds = array<i64: 8, 16>}, {transform_indices = @transform_4, window_bounds = array<i64: 8, 16>}, {transform_indices = @transform_5, window_bounds = array<i64: 8, 16>}]} {
    %c0_i32 = arith.constant 0 : i32
    %0 = arith.cmpi eq, %arg1, %c0_i32 : i32
    %1 = arith.extui %0 : i1 to i32
    %c0_i32_0 = arith.constant 0 : i32
    %2 = arith.cmpi ne, %1, %c0_i32_0 : i32
    scf.if %2 {
      %cst_19 = arith.constant 0.000000e+00 : f32
      %35 = vector.broadcast %cst_19 : f32 to vector<8x16xf32>
      %c0_20 = arith.constant 0 : index
      %c0_21 = arith.constant 0 : index
      %36 = vector.load %arg5[%c0_20, %c0_21] : memref<8x16xf32, #tpu.memory_space<vmem>>, vector<8x16xf32>
      tpu.vector_store %arg5[%c0_20, %c0_21], %35 {strides = array<i32>} : memref<8x16xf32, #tpu.memory_space<vmem>>, vector<8x16xf32>,
      %cst_22 = arith.constant 0.000000e+00 : f32
      %37 = vector.broadcast %cst_22 : f32 to vector<8x16xf32>
      %c0_23 = arith.constant 0 : index
      %c0_24 = arith.constant 0 : index
      %38 = vector.load %arg6[%c0_23, %c0_24] : memref<8x16xf32, #tpu.memory_space<vmem>>, vector<8x16xf32>
      tpu.vector_store %arg6[%c0_23, %c0_24], %37 {strides = array<i32>} : memref<8x16xf32, #tpu.memory_space<vmem>>, vector<8x16xf32>,
      %cst_25 = arith.constant 0.000000e+00 : f32
      %39 = vector.broadcast %cst_25 : f32 to vector<8x16xf32>
      %c0_26 = arith.constant 0 : index
      %c0_27 = arith.constant 0 : index
      %40 = vector.load %arg7[%c0_26, %c0_27] : memref<8x16xf32, #tpu.memory_space<vmem>>, vector<8x16xf32>
      tpu.vector_store %arg7[%c0_26, %c0_27], %39 {strides = array<i32>} : memref<8x16xf32, #tpu.memory_space<vmem>>, vector<8x16xf32>,
    } else {
    }
    %c0 = arith.constant 0 : index
    %c0_1 = arith.constant 0 : index
    %3 = vector.load %arg2[%c0, %c0_1] : memref<8x16xf32, #tpu.memory_space<vmem>>, vector<8x16xf32>
    %c0_2 = arith.constant 0 : index
    %c0_3 = arith.constant 0 : index
    %4 = vector.load %arg3[%c0_2, %c0_3] : memref<8x16xf32, #tpu.memory_space<vmem>>, vector<8x16xf32>
    %c1_i32 = arith.constant 1 : i32
    %5 = arith.muli %arg0, %c1_i32 : i32
    %6 = arith.addi %5, %arg1 : i32
    %c8_i32 = arith.constant 8 : i32
    %7 = arith.muli %6, %c8_i32 : i32
    %8 = tpu.assume_multiple %7, 8 : i32
    %9 = arith.index_cast %8 : i32 to index
    %c0_4 = arith.constant 0 : index
    %10 = vector.load %arg4[%9, %c0_4] : memref<16x1xf32, #tpu.memory_space<vmem>>, vector<8x1xf32>
    %11 = arith.subf %3, %4 : vector<8x16xf32>
    %12 = vector.broadcast %10 : vector<8x1xf32> to vector<8x16xf32>
    %13 = arith.mulf %11, %12 : vector<8x16xf32>
    %c0_5 = arith.constant 0 : index
    %c0_6 = arith.constant 0 : index
    %14 = vector.load %arg5[%c0_5, %c0_6] : memref<8x16xf32, #tpu.memory_space<vmem>>, vector<8x16xf32>
    %15 = arith.mulf %13, %13 : vector<8x16xf32>
    %16 = vector.shape_cast %15 : vector<8x16xf32> to vector<1x8x16xf32>
    %cst = arith.constant dense<0.000000e+00> : vector<8x16xf32>
    %17 = vector.multi_reduction <add>, %16, %cst [0] : vector<1x8x16xf32> to vector<8x16xf32>
    %18 = arith.addf %14, %17 : vector<8x16xf32>
    %c0_7 = arith.constant 0 : index
    %c0_8 = arith.constant 0 : index
    %19 = vector.load %arg5[%c0_7, %c0_8] : memref<8x16xf32, #tpu.memory_space<vmem>>, vector<8x16xf32>
    tpu.vector_store %arg5[%c0_7, %c0_8], %18 {strides = array<i32>} : memref<8x16xf32, #tpu.memory_space<vmem>>, vector<8x16xf32>,
    %c0_9 = arith.constant 0 : index
    %c0_10 = arith.constant 0 : index
    %20 = vector.load %arg6[%c0_9, %c0_10] : memref<8x16xf32, #tpu.memory_space<vmem>>, vector<8x16xf32>
    %21 = math.absf %13 : vector<8x16xf32>
    %22 = vector.shape_cast %21 : vector<8x16xf32> to vector<1x8x16xf32>
    %cst_11 = arith.constant dense<0.000000e+00> : vector<8x16xf32>
    %23 = vector.multi_reduction <add>, %22, %cst_11 [0] : vector<1x8x16xf32> to vector<8x16xf32>
    %24 = arith.addf %20, %23 : vector<8x16xf32>
    %c0_12 = arith.constant 0 : index
    %c0_13 = arith.constant 0 : index
    %25 = vector.load %arg6[%c0_12, %c0_13] : memref<8x16xf32, #tpu.memory_space<vmem>>, vector<8x16xf32>
    tpu.vector_store %arg6[%c0_12, %c0_13], %24 {strides = array<i32>} : memref<8x16xf32, #tpu.memory_space<vmem>>, vector<8x16xf32>,
    %26 = vector.extract_strided_slice %3 {offsets = [0, 1], sizes = [8, 15], strides = [1, 1]} : vector<8x16xf32> to vector<8x15xf32>
    %27 = vector.extract_strided_slice %3 {offsets = [0, 0], sizes = [8, 15], strides = [1, 1]} : vector<8x16xf32> to vector<8x15xf32>
    %28 = arith.subf %26, %27 : vector<8x15xf32>
    %c0_14 = arith.constant 0 : index
    %c0_15 = arith.constant 0 : index
    %29 = vector.load %arg7[%c0_14, %c0_15] : memref<8x16xf32, #tpu.memory_space<vmem>>, vector<8x15xf32>
    %30 = arith.mulf %28, %28 : vector<8x15xf32>
    %31 = vector.shape_cast %30 : vector<8x15xf32> to vector<1x8x15xf32>
    %cst_16 = arith.constant dense<0.000000e+00> : vector<8x15xf32>
    %32 = vector.multi_reduction <add>, %31, %cst_16 [0] : vector<1x8x15xf32> to vector<8x15xf32>
    %33 = arith.addf %29, %32 : vector<8x15xf32>
    %c0_17 = arith.constant 0 : index
    %c0_18 = arith.constant 0 : index
    %34 = vector.load %arg7[%c0_17, %c0_18] : memref<8x16xf32, #tpu.memory_space<vmem>>, vector<8x15xf32>
    tpu.vector_store %arg7[%c0_17, %c0_18], %33 {strides = array<i32>} : memref<8x16xf32, #tpu.memory_space<vmem>>, vector<8x15xf32>,
    return
  }
  func.func @transform_0(%arg0: i32, %arg1: i32) -> (i32, i32) {
    %c1_i32 = arith.constant 1 : i32
    %0 = arith.muli %arg0, %c1_i32 : i32
    %1 = arith.addi %0, %arg1 : i32
    %c0_i32 = arith.constant 0 : i32
    %c0_i32_0 = arith.constant 0 : i32
    return %1, %c0_i32 : i32, i32
  }
  func.func @transform_1(%arg0: i32, %arg1: i32) -> (i32, i32) {
    %c1_i32 = arith.constant 1 : i32
    %0 = arith.muli %arg0, %c1_i32 : i32
    %1 = arith.addi %0, %arg1 : i32
    %c0_i32 = arith.constant 0 : i32
    %c0_i32_0 = arith.constant 0 : i32
    return %1, %c0_i32 : i32, i32
  }
  func.func @transform_2(%arg0: i32, %arg1: i32) -> (i32, i32) {
    %c0_i32 = arith.constant 0 : i32
    %c0_i32_0 = arith.constant 0 : i32
    %c0_i32_1 = arith.constant 0 : i32
    return %c0_i32, %c0_i32_0 : i32, i32
  }
  func.func @transform_3(%arg0: i32, %arg1: i32) -> (i32, i32) {
    %c0_i32 = arith.constant 0 : i32
    %c0_i32_0 = arith.constant 0 : i32
    return %arg0, %c0_i32 : i32, i32
  }
  func.func @transform_4(%arg0: i32, %arg1: i32) -> (i32, i32) {
    %c0_i32 = arith.constant 0 : i32
    %c0_i32_0 = arith.constant 0 : i32
    return %arg0, %c0_i32 : i32, i32
  }
  func.func @transform_5(%arg0: i32, %arg1: i32) -> (i32, i32) {
    %c0_i32 = arith.constant 0 : i32
    %c0_i32_0 = arith.constant 0 : i32
    return %arg0, %c0_i32 : i32, i32
  }
}

</mosaic_0001>

<bundles_post_ra>
// kernel: _simple_enhanced_loss_impl.1
= control target key start
LH: loop header
LB: loop body
LE: loop exit
PB: predicated region body
PF: predicated region fallthrough
CT: control target
= control target key end

     0   :  { %s569_s18 = smov 0   ;;  %s571_s19 = smov 0   ;;  %s619_s0 = inlined_call_operand.vmem [shape: f32[16,16], index: 0, kind: input, shape index: {}]   ;;  %s620_s1 = inlined_call_operand.vmem [shape: f32[16,16], index: 1, kind: input, shape index: {}]   ;;  %s621_s2 = inlined_call_operand.vmem [shape: f32[16,1], index: 2, kind: input, shape index: {}]   ;;  %s622_s3 = inlined_call_operand.vmem [shape: f32[16,16], index: 3, kind: output, shape index: {0}]   ;;  %s623_s4 = inlined_call_operand.vmem [shape: f32[16,16], index: 4, kind: output, shape index: {1}]   ;;  %s624_s5 = inlined_call_operand.vmem [shape: f32[16,16], index: 5, kind: output, shape index: {2}]  }
   0x1   :  { %s573_s20 = smov 0  }
   0x2 LB: > { %s28_s21 = sadd.s32 1, %s529_s19  ;;  %p473_p0 = scmp.ge.s32.totalorder %s533_s20, 1  ;;  %s533_s20 = sphi %s573_s20, %s16_s20   ;;  %s529_s19 = sphi %s571_s19, %s626_s19   ;;  %s525_s18 = sphi %s569_s18, %s625_s18  }
   0x3   : > { %p30_p1 = scmp.ge.s32.totalorder %s28_s21, 2  ;;  %p220_p2 = scmp.lt.s32.totalorder %s533_s20, 3 }
   0x5   : > { %s628_s21 = smov (%p30_p1, %s28_s21), 0  ;;  %p221_p3 = pnand %p473_p0, %p220_p2 }
   0x6   : > { %p261_p4 = scmp.lt.s32.totalorder (!%p221_p3), %s525_s18, 1  ;;  %s479_s22 = sshll.u32 (!%p221_p3), %s525_s18, 3 }
   0x7   : > { %224 = sbr.rel (%p221_p3) target bundleno = 253 (0xfd), region = 32  ;;  %s296_s29 = scalar_lea.vmem (!%p221_p3), %s621_s2, %s479_s22 }
   0x8   : > { %s536_s11 = smov (!%p221_p3), 1  }
   0xc   : > { %v535_v0 = vmov 0   ;;  %s630_s18 = smov (!%p261_p4, %s525_s18), 1  ;;  %vm288_vm0 = vcmask 130048   ;;  %v537_v2 = vmov 0.0   ;;  %v297_v3 = vld [vmem:[%s296_s29] sm:$0xff]  ;;  %vm329_vm1 = vcmask 121856  }
   0xd   : > { %510 = vset.pattern.permute.xlu0 %v535_v0  ;;  %s474_s23 = sshll.u32 %s630_s18, 3  ;;  %s538_s18 = smov 127  }
   0xe   : > { %s264_s26 = scalar_lea.vmem %s619_s0, %s474_s23  ;;  %s275_s7 = scalar_lea.vmem %s622_s3, %s474_s23 }
   0xf   : > { %v292_v1 = vld [vmem:[%s264_s26] sm:$0xff]  ;;  %s279_s10 = scalar_lea.vmem %s623_s4, %s474_s23  ;;  %289 = vst.msk [vmem:[%s275_s7] sm:$0xff] %vm288_vm0, %v537_v2  ;;  %s283_s14 = scalar_lea.vmem %s624_s5, %s474_s23 }
  0x10   : > { %317 = vrot.lane.b32.xlu0 %v292_v1, %s536_s11  ;;  %290 = vst.msk [vmem:[%s279_s10] sm:$0xff] %vm288_vm0, %v537_v2  ;;  %291 = vst.msk [vmem:[%s283_s14] sm:$0xff] %vm288_vm0, %v537_v2  ;;  %s270_s17 = scalar_lea.vmem %s620_s1, %s474_s23 }
  0x11   : > { %v293_v7 = vld [vmem:[%s270_s17] sm:$0xff] }
  0x12   : > { %v298_v8 = vsub.f32 %v292_v1, %v293_v7 }
  0x14   : > { %301 = vperm.xlu0 %510, %v297_v3  }
  0x16   : > { %v305_v11 = vld [vmem:[%s275_s7] sm:$0xff] }
  0x17   : > { %v311_v12 = vld [vmem:[%s279_s10] sm:$0xff] }
  0x18   : > { %v321_v17 = vld [vmem:[%s283_s14] sm:$0xff] }
  0x82   : > { %v318_v4 = vpop.permute.xlu0 %317 }
  0x83   : > { %v320_v5 = vsub.f32 %v292_v1, %v318_v4 }
  0x85   : > { %v322_v6 = vmul.f32 %v320_v5, %v320_v5 }
  0x87   : > { %325 = vrot.lane.b32.xlu1 %v322_v6, %s538_s18 }
  0x8f   : > { %v302_v9 = vpop.permute.xlu0 %301 }
  0x90   : > { %v304_v10 = vmul.f32 %v302_v9, %v298_v8 }
  0x92   : > { %v306_v13 = vmul.f32 %v304_v10, %v304_v10  ;;  %v312_v14 = vand.u32 2147483647, %v304_v10 }
  0x94   : > { %v308_v15 = vadd.f32 %v306_v13, %v305_v11  ;;  %v314_v16 = vadd.f32 %v312_v14, %v311_v12 }
  0x96   : > { %310 = vst.msk [vmem:[%s275_s7] sm:$0xff] %vm288_vm0, %v308_v15  ;;  %315 = vst.msk [vmem:[%s279_s10] sm:$0xff] %vm288_vm0, %v314_v16 }
  0xf9   : > { %v326_v18 = vpop.permute.xlu1 %325 }
  0xfa   : > { %v328_v19 = vadd.f32 %v326_v18, %v321_v17 }
  0xfc   : > { %330 = vst.msk [vmem:[%s283_s14] sm:$0xff] %vm329_vm1, %v328_v19 }
  0xfd PF: > { %s16_s20 = sadd.s32 1, %s533_s20   ;;  %s625_s18 = smov %s529_s19 }
  0xfe   : > { %p13_p5 = scmp.ge.s32.totalorder %s16_s20, 4   ;;  %s626_s19 = smov %s628_s21 }
 0x100   :  { %15 = sbr.rel (!%p13_p5) target bundleno = 2 (0x2), region = 94 }

</bundles_post_ra>
